<compile_context>
chip_gen: v6e
topology: v6e:2x2x1
jax: 0.10.0
libtpu: 0.0.40
codegen_flags: <defaults>
</compile_context>

<pallas_src>
import functools

import jax
import jax.numpy as jnp
from jax.experimental import pallas as pl
from jax.experimental.pallas import tpu as pltpu


def _mlp2_kernel(x_ref, w1_ref, b1_ref, w2_ref, b2_ref, o_ref):
    """relu(relu(x @ w1 + b1) @ w2 + b2) for one tile of rows."""
    # In-kernel f32 -> bf16 cast: avoids a separate XLA cast op + HBM copy.
    x = x_ref[...].astype(jnp.bfloat16)                                 # (tn, D) bf16
    h1 = jnp.dot(x, w1_ref[...], preferred_element_type=jnp.float32)   # (tn, H) f32
    h1 = jnp.maximum(h1 + b1_ref[...], 0.0)                            # bias (1, H) broadcasts
    h1 = h1.astype(jnp.bfloat16)                                       # bf16 operand, 2nd MXU pass
    h2 = jnp.dot(h1, w2_ref[...], preferred_element_type=jnp.float32)  # (tn, H) f32
    h2 = jnp.maximum(h2 + b2_ref[...], 0.0)
    o_ref[...] = h2.astype(o_ref.dtype)


def prepare_params(w1, b1, w2, b2):
    """One-time parameter prep: bf16 MXU weights, (1, H) f32 biases."""
    h = w1.shape[1]
    return (w1.astype(jnp.bfloat16),
            b1.reshape(1, h).astype(jnp.float32),
            w2.astype(jnp.bfloat16),
            b2.reshape(1, h).astype(jnp.float32))


@functools.partial(jax.jit, static_argnames=("row_tile", "out_dtype"))
def roi_car_cls_rot_head_forward(x_nchw, w1_bf, b1_2d, w2_bf, b2_2d, *,
                                 row_tile=None, out_dtype=jnp.bfloat16):
    """x_nchw: (N, C, R, R) f32 ROI-pooled features (post roi_xform).

    w1_bf: (C*R*R, H) bf16, b1_2d: (1, H) f32, w2_bf: (H, H) bf16, b2_2d: (1, H) f32.
    Returns (N, H) in `out_dtype`.
    """
    n = x_nchw.shape[0]
    d = w1_bf.shape[0]
    h = w1_bf.shape[1]

    # Glue: PyTorch's x.view(batch_size, -1) on a contiguous NCHW tensor
    # (free metadata reshape; stays f32 -- cast happens in-kernel).
    x2d = x_nchw.reshape(n, d)

    if row_tile is None:
        # >=2 grid steps for small N (keeps both v7x TCs busy); larger tiles
        # for bigger N to amortize per-step overhead on single-TC v5e/v6e.
        row_tile = 128 if n <= 256 else 256
    row_tile = min(row_tile, max(8, ((n + 7) // 8) * 8))  # keep multiple of 8

    num_tiles = pl.cdiv(n, row_tile)  # ragged last block is masked by Pallas

    out_bytes = jnp.dtype(out_dtype).itemsize
    # VMEM budget: resident weights/biases + double-buffered x/out tiles.
    resident_bytes = (
        d * h * 2 + h * h * 2              # w1, w2 (bf16, single-buffered)
        + 2 * h * 4                        # b1, b2 (f32)
        + 2 * row_tile * d * 4             # x tile, double-buffered, f32
        + 2 * row_tile * h * out_bytes     # out tile, double-buffered
    )
    vmem_limit = int(min(max(2 * resident_bytes, 8 << 20), 48 << 20))

    cost = pl.CostEstimate(
        flops=2 * n * (d * h + h * h),
        transcendentals=0,
        bytes_accessed=(n * d * 4 + d * h * 2 + h * h * 2
                        + 2 * h * 4 + n * h * out_bytes),
    )

    resident = dict(pipeline_mode=pl.Buffered(1))

    out = pl.pallas_call(
        _mlp2_kernel,
        out_shape=jax.ShapeDtypeStruct((n, h), out_dtype),
        grid=(num_tiles,),
        in_specs=[
            pl.BlockSpec((row_tile, d), lambda i: (i, 0)),            # x rows tile (f32)
            pl.BlockSpec((d, h), lambda i: (0, 0), **resident),       # w1 (resident, bf16)
            pl.BlockSpec((1, h), lambda i: (0, 0), **resident),       # b1 (f32)
            pl.BlockSpec((h, h), lambda i: (0, 0), **resident),       # w2 (resident, bf16)
            pl.BlockSpec((1, h), lambda i: (0, 0), **resident),       # b2 (f32)
        ],
        out_specs=pl.BlockSpec((row_tile, h), lambda i: (i, 0)),
        compiler_params=pltpu.CompilerParams(
            dimension_semantics=("parallel",),
            vmem_limit_bytes=vmem_limit,
        ),
        cost_estimate=cost,
    )(x2d, w1_bf, b1_2d, w2_bf, b2_2d)

    return out


def xavier_fill(key, shape):
    """Caffe2 XavierFill: uniform(-s, s), s = sqrt(3 / fan_in).

    Weight is built directly in (in, out) layout for the kernel's x @ W form.
    """
    fan_in, fan_out = shape  # (in, out)
    scale = jnp.sqrt(3.0 / fan_in)
    return jax.random.uniform(key, (fan_in, fan_out), jnp.float32, -scale, scale)


def reference_forward(x_nchw, w1, b1, w2, b2):
    n = x_nchw.shape[0]
    x2d = x_nchw.reshape(n, -1)
    h1 = jnp.maximum(x2d @ w1 + b1, 0.0)
    h2 = jnp.maximum(h1 @ w2 + b2, 0.0)
    return h2


if __name__ == "__main__":
    # Module-consistent small shapes:
    #   num_rois (batch) = 200 (NOT a multiple of the 128-row tile -> exercises
    #   the masked ragged final block and gives a 2-step parallel grid),
    #   dim_in (C) = 8, ROI_XFORM_RESOLUTION = 4, MLP_HEAD_DIM = 128
    #   -> D = 8*4*4 = 128.
    N, C, R, HID = 200, 8, 4, 128
    D = C * R * R

    key = jax.random.PRNGKey(0)
    kx, k1, k2 = jax.random.split(key, 3)

    # x stands in for roi_xform(...) output: (N, C, R, R) NCHW f32.
    x = jax.random.normal(kx, (N, C, R, R), jnp.float32)

    # Deterministic XavierFill weights, zero biases (as in _init_weights).
    w1 = xavier_fill(k1, (D, HID))
    b1 = jnp.zeros((HID,), jnp.float32)
    w2 = xavier_fill(k2, (HID, HID))
    b2 = jnp.zeros((HID,), jnp.float32)

    # One-time parameter prep (bf16 weights, reshaped biases).
    params = prepare_params(w1, b1, w2, b2)

    out = roi_car_cls_rot_head_forward(x, *params)
    out = jax.block_until_ready(out)

    ref = reference_forward(x, w1, b1, w2, b2)
    assert out.shape == (N, HID)
    # bf16 MXU operands + bf16 output with f32 accumulation: allow small drift.
    assert jnp.allclose(out.astype(jnp.float32), ref, atol=3e-2, rtol=3e-2), \
        "mismatch vs reference"

    print("KERNEL_OK")
</pallas_src>

<mosaic_0001>
module attributes {stable_mosaic.version = 11 : i64} {
  func.func @_mlp2_kernel(%arg0: i32, %arg1: memref<128x128xf32, #tpu.memory_space<vmem>>, %arg2: memref<128x128xbf16, #tpu.memory_space<vmem>>, %arg3: memref<1x128xf32, #tpu.memory_space<vmem>>, %arg4: memref<128x128xbf16, #tpu.memory_space<vmem>>, %arg5: memref<1x128xf32, #tpu.memory_space<vmem>>, %arg6: memref<128x128xbf16, #tpu.memory_space<vmem>>) attributes {dimension_semantics = [#tpu.dimension_semantics<parallel>], iteration_bounds = array<i64: 2>, scalar_prefetch = 0 : i64, scratch_operands = 0 : i64, tpu.core_type = #tpu.core_type<tc>, window_params = [{transform_indices = @transform_0, window_bounds = array<i64: 128, 128>}, {pipeline_mode = #tpu.pipeline_mode<synchronous>, transform_indices = @transform_1, window_bounds = array<i64: 128, 128>}, {pipeline_mode = #tpu.pipeline_mode<synchronous>, transform_indices = @transform_2, window_bounds = array<i64: 1, 128>}, {pipeline_mode = #tpu.pipeline_mode<synchronous>, transform_indices = @transform_3, window_bounds = array<i64: 128, 128>}, {pipeline_mode = #tpu.pipeline_mode<synchronous>, transform_indices = @transform_4, window_bounds = array<i64: 1, 128>}, {transform_indices = @transform_5, window_bounds = array<i64: 128, 128>}]} {
    %c0 = arith.constant 0 : index
    %c0_0 = arith.constant 0 : index
    %0 = vector.load %arg1[%c0, %c0_0] : memref<128x128xf32, #tpu.memory_space<vmem>>, vector<128x128xf32>
    %1 = arith.truncf %0 : vector<128x128xf32> to vector<128x128xbf16>
    %c0_1 = arith.constant 0 : index
    %c0_2 = arith.constant 0 : index
    %2 = vector.load %arg2[%c0_1, %c0_2] : memref<128x128xbf16, #tpu.memory_space<vmem>>, vector<128x128xbf16>
    %cst = arith.constant dense<0.000000e+00> : vector<128x128xf32>
    %3 = tpu.matmul %1, %2, %cst {dimension_numbers = #tpu.dot_dimension_numbers<[1], [0], [0], [1], [0, 0, 1, 1], [], []>} : vector<128x128xbf16>, vector<128x128xbf16>, vector<128x128xf32> -> vector<128x128xf32>
    %c0_3 = arith.constant 0 : index
    %c0_4 = arith.constant 0 : index
    %4 = vector.load %arg3[%c0_3, %c0_4] : memref<1x128xf32, #tpu.memory_space<vmem>>, vector<1x128xf32>
    %5 = vector.broadcast %4 : vector<1x128xf32> to vector<128x128xf32>
    %6 = arith.addf %3, %5 : vector<128x128xf32>
    %cst_5 = arith.constant 0.000000e+00 : f32
    %7 = vector.broadcast %cst_5 : f32 to vector<128x128xf32>
    %8 = arith.maximumf %6, %7 : vector<128x128xf32>
    %9 = arith.truncf %8 : vector<128x128xf32> to vector<128x128xbf16>
    %c0_6 = arith.constant 0 : index
    %c0_7 = arith.constant 0 : index
    %10 = vector.load %arg4[%c0_6, %c0_7] : memref<128x128xbf16, #tpu.memory_space<vmem>>, vector<128x128xbf16>
    %cst_8 = arith.constant dense<0.000000e+00> : vector<128x128xf32>
    %11 = tpu.matmul %9, %10, %cst_8 {dimension_numbers = #tpu.dot_dimension_numbers<[1], [0], [0], [1], [0, 0, 1, 1], [], []>} : vector<128x128xbf16>, vector<128x128xbf16>, vector<128x128xf32> -> vector<128x128xf32>
    %c0_9 = arith.constant 0 : index
    %c0_10 = arith.constant 0 : index
    %12 = vector.load %arg5[%c0_9, %c0_10] : memref<1x128xf32, #tpu.memory_space<vmem>>, vector<1x128xf32>
    %13 = vector.broadcast %12 : vector<1x128xf32> to vector<128x128xf32>
    %14 = arith.addf %11, %13 : vector<128x128xf32>
    %cst_11 = arith.constant 0.000000e+00 : f32
    %15 = vector.broadcast %cst_11 : f32 to vector<128x128xf32>
    %16 = arith.maximumf %14, %15 : vector<128x128xf32>
    %17 = arith.truncf %16 : vector<128x128xf32> to vector<128x128xbf16>
    %c0_12 = arith.constant 0 : index
    %c0_13 = arith.constant 0 : index
    %18 = vector.load %arg6[%c0_12, %c0_13] : memref<128x128xbf16, #tpu.memory_space<vmem>>, vector<128x128xbf16>
    tpu.vector_store %arg6[%c0_12, %c0_13], %17 {strides = array<i32>} : memref<128x128xbf16, #tpu.memory_space<vmem>>, vector<128x128xbf16>,
    return
  }
  func.func @transform_0(%arg0: i32) -> (i32, i32) {
    %c0_i32 = arith.constant 0 : i32
    %c0_i32_0 = arith.constant 0 : i32
    return %arg0, %c0_i32 : i32, i32
  }
  func.func @transform_1(%arg0: i32) -> (i32, i32) {
    %c0_i32 = arith.constant 0 : i32
    %c0_i32_0 = arith.constant 0 : i32
    %c0_i32_1 = arith.constant 0 : i32
    return %c0_i32, %c0_i32_0 : i32, i32
  }
  func.func @transform_2(%arg0: i32) -> (i32, i32) {
    %c0_i32 = arith.constant 0 : i32
    %c0_i32_0 = arith.constant 0 : i32
    %c0_i32_1 = arith.constant 0 : i32
    return %c0_i32, %c0_i32_0 : i32, i32
  }
  func.func @transform_3(%arg0: i32) -> (i32, i32) {
    %c0_i32 = arith.constant 0 : i32
    %c0_i32_0 = arith.constant 0 : i32
    %c0_i32_1 = arith.constant 0 : i32
    return %c0_i32, %c0_i32_0 : i32, i32
  }
  func.func @transform_4(%arg0: i32) -> (i32, i32) {
    %c0_i32 = arith.constant 0 : i32
    %c0_i32_0 = arith.constant 0 : i32
    %c0_i32_1 = arith.constant 0 : i32
    return %c0_i32, %c0_i32_0 : i32, i32
  }
  func.func @transform_5(%arg0: i32) -> (i32, i32) {
    %c0_i32 = arith.constant 0 : i32
    %c0_i32_0 = arith.constant 0 : i32
    return %arg0, %c0_i32 : i32, i32
  }
}

</mosaic_0001>

<bundles_post_ra>
// kernel: roi_car_cls_rot_head_forward.1
= control target key start
LH: loop header
LB: loop body
LE: loop exit
PB: predicated region body
PF: predicated region fallthrough
CT: control target
= control target key end

     0   :  { %10 = vsyncpa [#allocation3], 0  ;;  %s1377_s0 = inlined_call_operand.vmem [shape: f32[200,128], index: 0, kind: input, shape index: {}]   ;;  %s1378_s1 = inlined_call_operand.vmem [shape: bf16[128,128], index: 1, kind: input, shape index: {}]   ;;  %s1379_s2 = inlined_call_operand.vmem [shape: f32[1,128], index: 2, kind: input, shape index: {}]   ;;  %s1380_s3 = inlined_call_operand.vmem [shape: bf16[128,128], index: 3, kind: input, shape index: {}]   ;;  %s1381_s4 = inlined_call_operand.vmem [shape: f32[1,128], index: 4, kind: input, shape index: {}]   ;;  %s1382_s5 = inlined_call_operand.hbm [shape: bf16[200,128], index: 5, kind: output, shape index: {}]  }
   0x1   :  { %12 = vsyncpa [#allocation3 + $0x1], 0  ;;  %s1174_s18 = smov 0   ;;  %s1176_s19 = smov 0  }
   0x2   :  { %s1178_s20 = smov 0   ;;  %s1180_s21 = smov 0  }
   0x3 LB: > { %s1195_s22 = sadd.s32 4294967295, %s1139_s21   ;;  %s813_s23 = sadd.s32 4294967294, %s1139_s21   ;;  %s1139_s21 = sphi %s1180_s21, %s1388_s21   ;;  %s1135_s20 = sphi %s1178_s20, %s1387_s20   ;;  %s1131_s19 = sphi %s1176_s19, %s1386_s19   ;;  %s1127_s18 = sphi %s1174_s18, %s1385_s18  }
   0x4   : > { %s1199_s24 = sadd.s32 1, %s1139_s21   ;;  %s135_s25 = sadd.s32 1, %s1135_s20 }
   0x5   : > { %s132_s26 = ssub.s32 %s1139_s21, %s1199_s24  ;;  %p145_p0 = scmp.ne.s32.totalorder %s1135_s20, %s1131_s19 }
   0x6   : > { %p133_p1 = scmp.eq.s32.totalorder %s132_s26, 0  ;;  %p146_p2 = scmp.eq.s32.totalorder %s1195_s22, 1 }
   0x7   : > { %p151_p3 = scmp.ne.s32.totalorder %s1131_s19, %s1127_s18  ;;  %p152_p4 = scmp.eq.s32.totalorder %s813_s23, 1 }
   0x8   : > { %s1210_s27 = scalar_select %p133_p1, %s1135_s20, %s135_s25  }
   0x9   : > { %p1212_p5 = por %p146_p2, %p145_p0  ;;  %p1216_p6 = por %p152_p4, %p151_p3 }
   0xa   : > { %p816_p7 = scmp.ge.s32.totalorder %s1139_s21, 1  ;;  %p199_p8 = scmp.lt.s32.totalorder %s1139_s21, 3 }
   0xc   : > { %p200_p9 = pnand %p816_p7, %p199_p8 }
   0xd   : > { %s1226_s7 = sshll.u32 (!%p200_p9), %s1195_s22, 4  ;;  %s228_s15 = sand.u32 (!%p200_p9), 1, %s1131_s19  }
   0xe   : > { %203 = sbr.rel (%p200_p9) target bundleno = 515 (0x203), region = 40  ;;  %p236_p10 = scmp.lt.s32.totalorder (!%p200_p9), %s1226_s7, 24 }
   0xf   : > { %s817_s25 = sshll.u32 (!%p200_p9), %s228_s15, 6  ;;  %s1317_s30 = scalar_lea.sflag (!%p200_p9), [#allocation3], %s228_s15 }
  0x10   : > { %s1305_s26 = scalar_lea.vmem (!%p200_p9), [#allocation2], %s817_s25 }
  0x13   : > { %v1063_v0 = vld [vmem:[%s1378_s1 + $0x38] sm:$0xff]   ;;  %v1064_v1 = vld [vmem:[%s1378_s1 + $0x30] sm:$0xff]   ;;  %s237_s10 = scalar_select %p236_p10, %s1226_s7, 24  ;;  %v1065_v2 = vld [vmem:[%s1378_s1 + $0x28] sm:$0xff]  }
  0x14   : > { %959 = vmatprep.subr.bf16.mxu0 %v1063_v0  ;;  %v1066_v3 = vld [vmem:[%s1378_s1 + $0x20] sm:$0xff]   ;;  %v1067_v7 = vld [vmem:[%s1378_s1 + $0x18] sm:$0xff]   ;;  %v1072_v9 = vld [vmem:[%s1380_s3 + $0x30] sm:$0xff]   ;;  %s740_s6 = ssub.s32 (%p1212_p5), 25, %s1226_s7 }
  0x15   : > { %960 = vmatpush3.bf16.msra.mxu0 %v1063_v0  ;;  %s819_s13 = sshll.u32 %s237_s10, 3  ;;  %v1071_v8 = vld [vmem:[%s1380_s3 + $0x38] sm:$0xff]   ;;  %v1068_v10 = vld [vmem:[%s1378_s1 + $0x10] sm:$0xff]   ;;  %v1073_v11 = vld [vmem:[%s1380_s3 + $0x28] sm:$0xff]   ;;  %p741_p11 = scmp.lt.s32.totalorder (%p1212_p5), %s740_s6, 16 }
  0x16   : > { %961 = vmatprep.subr.bf16.mxu0 %v1064_v1  ;;  %s1239_s16 = scalar_lea.vmem %s1377_s0, %s819_s13  ;;  %991 = vmatprep.subr.bf16.mxu1 %v1071_v8  ;;  %v1069_v12 = vld [vmem:[%s1378_s1 + $0x8] sm:$0xff]   ;;  %v1074_v13 = vld [vmem:[%s1380_s3 + $0x20] sm:$0xff]   ;;  %v1075_v15 = vld [vmem:[%s1380_s3 + $0x18] sm:$0xff]  }
  0x17   : > { %v251_v4 = vld [vmem:[%s1239_s16] sm:$0xff]  ;;  %v252_v5 = vld [vmem:[%s1239_s16 + $0x8] sm:$0xff]  ;;  %992 = vmatpush3.bf16.msra.mxu1 %v1071_v8  ;;  %v253_v16 = vld [vmem:[%s1239_s16 + $0x10] sm:$0xff] }
  0x18   : > { %v267_v6 = vpack.c.bf16 %v252_v5, %v251_v4  ;;  %993 = vmatprep.subr.bf16.mxu1 %v1072_v9  ;;  %v1070_v14 = vld [vmem:[%s1378_s1] sm:$0xff]   ;;  %v254_v17 = vld [vmem:[%s1239_s16 + $0x18] sm:$0xff]  ;;  %v256_v19 = vld [vmem:[%s1239_s16 + $0x28] sm:$0xff] }
  0x19   : > { %962 = vmatpush3.bf16.msra.mxu0 %v1064_v1  ;;  %v255_v18 = vld [vmem:[%s1239_s16 + $0x20] sm:$0xff]  ;;  %v268_v20 = vpack.c.bf16 %v254_v17, %v253_v16  ;;  %v257_v22 = vld [vmem:[%s1239_s16 + $0x30] sm:$0xff]  ;;  %v258_v23 = vld [vmem:[%s1239_s16 + $0x38] sm:$0xff] }
  0x1a   : > { %963 = vmatprep.subr.bf16.mxu0 %v1065_v2  ;;  %975 = vmatprep.mubr.bf16.mxu0 %v267_v6  ;;  %v269_v21 = vpack.c.bf16 %v256_v19, %v255_v18  ;;  %v259_v24 = vld [vmem:[%s1239_s16 + $0x40] sm:$0xff]  ;;  %v260_v25 = vld [vmem:[%s1239_s16 + $0x48] sm:$0xff]  ;;  %v270_v26 = vpack.c.bf16 %v258_v23, %v257_v22  ;;  %v261_v28 = vld [vmem:[%s1239_s16 + $0x50] sm:$0xff] }
  0x1b   : > { %994 = vmatpush3.bf16.msra.mxu1 %v1072_v9  ;;  %v271_v27 = vpack.c.bf16 %v260_v25, %v259_v24  ;;  %v262_v29 = vld [vmem:[%s1239_s16 + $0x58] sm:$0xff]  ;;  %v263_v30 = vld [vmem:[%s1239_s16 + $0x60] sm:$0xff]  ;;  %v264_v31 = vld [vmem:[%s1239_s16 + $0x68] sm:$0xff] }
  0x1c   : > { %995 = vmatprep.subr.bf16.mxu1 %v1073_v11  ;;  %v272_v32 = vpack.c.bf16 %v262_v29, %v261_v28  ;;  %v273_v33 = vpack.c.bf16 %v264_v31, %v263_v30  ;;  %v265_v34 = vld [vmem:[%s1239_s16 + $0x70] sm:$0xff]  ;;  %v266_v35 = vld [vmem:[%s1239_s16 + $0x78] sm:$0xff]  ;;  %v1077_v38 = vld [vmem:[%s1380_s3 + $0x8] sm:$0xff]  }
  0x1d   : > { %964 = vmatpush3.bf16.msra.mxu0 %v1065_v2  ;;  %v274_v36 = vpack.c.bf16 %v266_v35, %v265_v34  ;;  %v1076_v37 = vld [vmem:[%s1380_s3 + $0x10] sm:$0xff]   ;;  %v1078_v39 = vld [vmem:[%s1380_s3] sm:$0xff]  }
  0x1e   : > { %965 = vmatprep.subr.bf16.mxu0 %v1066_v3  ;;  %v820_v42 = vld [vmem:[%s1379_s2] ss:$0 sm:$0xff] }
  0x1f   : > { %996 = vmatpush3.bf16.msra.mxu1 %v1073_v11  ;;  %v829_v34 = vld [vmem:[%s1381_s4] ss:$0 sm:$0xff] }
  0x20   : > { %997 = vmatprep.subr.bf16.mxu1 %v1074_v13 }
  0x21   : > { %966 = vmatpush3.bf16.msra.mxu0 %v1066_v3 }
  0x22   : > { %967 = vmatprep.subr.bf16.mxu0 %v1067_v7 }
  0x23   : > { %998 = vmatpush3.bf16.msra.mxu1 %v1074_v13 }
  0x24   : > { %999 = vmatprep.subr.bf16.mxu1 %v1075_v15 }
  0x25   : > { %968 = vmatpush3.bf16.msra.mxu0 %v1067_v7 }
  0x26   : > { %969 = vmatprep.subr.bf16.mxu0 %v1068_v10 }
  0x27   : > { %1000 = vmatpush3.bf16.msra.mxu1 %v1075_v15 }
  0x28   : > { %1001 = vmatprep.subr.bf16.mxu1 %v1076_v37 }
  0x29   : > { %970 = vmatpush3.bf16.msra.mxu0 %v1068_v10 }
  0x2a   : > { %971 = vmatprep.subr.bf16.mxu0 %v1069_v12 }
  0x2b   : > { %1002 = vmatpush3.bf16.msra.mxu1 %v1076_v37 }
  0x2c   : > { %1003 = vmatprep.subr.bf16.mxu1 %v1077_v38 }
  0x2d   : > { %972 = vmatpush3.bf16.msra.mxu0 %v1069_v12 }
  0x2e   : > { %973 = vmatprep.subr.bf16.mxu0 %v1070_v14 }
  0x2f   : > { %1004 = vmatpush3.bf16.msra.mxu1 %v1077_v38 }
  0x30   : > { %1005 = vmatprep.subr.bf16.mxu1 %v1078_v39 }
  0x31   : > { %974 = vmatpush3.bf16.msra.mxu0 %v1070_v14 }
  0x33   : > { %1006 = vmatpush3.bf16.msra.mxu1 %v1078_v39 }
  0x34   : > { %976 = vmatmul.mubr.bf16.vlgmr.msra.gmra.mxu0 %v268_v20 }
  0x35   : > { %979 = vmatprep.mubr.bf16.mxu0 %v269_v21 }
  0x3c   : > { %980 = vmatmul.mubr.bf16.gmra.mxu0 %v270_v26 }
  0x3d   : > { %983 = vmatprep.mubr.bf16.mxu0 %v271_v27 }
  0x44   : > { %984 = vmatmul.mubr.bf16.gmra.mxu0 %v272_v32 }
  0x45   : > { %987 = vmatprep.mubr.bf16.mxu0 %v273_v33 }
  0x4c   : > { %988 = vmatmul.mubr.bf16.gmra.mxu0 %v274_v36 }
  0xf4   : > { %v977_v40 = vpop.f32.mrf.mxu0 }
  0xf5   : > { %v389_v46 = vadd.f32 %v977_v40, %v820_v42 }
  0xf6   : > { %v380_v41 = vpop.f32.mrf.mxu0 }
  0xf7   : > { %v381_v44 = vadd.f32 %v820_v42, %v380_v41  ;;  %v445_v53 = vmax.f32 %v389_v46, 0.0 }
  0xf8   : > { %v978_v43 = vpop.f32.mrf.mxu0 }
  0xf9   : > { %v392_v45 = vadd.f32 %v978_v43, %v820_v42  ;;  %v443_v51 = vmax.f32 %v381_v44, 0.0 }
  0xfa   : > { %v383_v47 = vpop.f32.mrf.mxu0 }
  0xfb   : > { %v384_v48 = vadd.f32 %v820_v42, %v383_v47  ;;  %v446_v49 = vmax.f32 %v392_v45, 0.0 }
  0xfc   : > { %v981_v50 = vpop.f32.mrf.mxu0 }
  0xfd   : > { %v444_v52 = vmax.f32 %v384_v48, 0.0  ;;  %v460_v56 = vpack.c.bf16 %v446_v49, %v445_v53  ;;  %v405_v60 = vadd.f32 %v981_v50, %v820_v42 }
  0xfe   : > { %v396_v54 = vpop.f32.mrf.mxu0 }
  0xff   : > { %v459_v55 = vpack.c.bf16 %v444_v52, %v443_v51  ;;  %v397_v58 = vadd.f32 %v820_v42, %v396_v54  ;;  %v449_v3 = vmax.f32 %v405_v60, 0.0 }
 0x100   : > { %v982_v57 = vpop.f32.mrf.mxu0 }
 0x101   : > { %v408_v59 = vadd.f32 %v982_v57, %v820_v42  ;;  %1007 = vmatprep.mubr.bf16.mxu1 %v459_v55  ;;  %v447_v1 = vmax.f32 %v397_v58, 0.0 }
 0x102   : > { %v399_v61 = vpop.f32.mrf.mxu0  ;;  %1008 = vmatmul.mubr.bf16.vlgmr.msra.gmra.mxu1 %v460_v56 }
 0x103   : > { %v400_v62 = vadd.f32 %v820_v42, %v399_v61  ;;  %v450_v63 = vmax.f32 %v408_v59, 0.0 }
 0x104   : > { %v985_v0 = vpop.f32.mrf.mxu0 }
 0x105   : > { %v448_v2 = vmax.f32 %v400_v62, 0.0  ;;  %v462_v6 = vpack.c.bf16 %v450_v63, %v449_v3  ;;  %v421_v10 = vadd.f32 %v985_v0, %v820_v42 }
 0x106   : > { %v412_v4 = vpop.f32.mrf.mxu0 }
 0x107   : > { %v461_v5 = vpack.c.bf16 %v448_v2, %v447_v1  ;;  %v413_v8 = vadd.f32 %v820_v42, %v412_v4  ;;  %v453_v17 = vmax.f32 %v421_v10, 0.0 }
 0x108   : > { %v986_v7 = vpop.f32.mrf.mxu0 }
 0x109   : > { %v424_v9 = vadd.f32 %v986_v7, %v820_v42  ;;  %1011 = vmatprep.mubr.bf16.mxu1 %v461_v5  ;;  %v451_v15 = vmax.f32 %v413_v8, 0.0 }
 0x10a   : > { %v415_v11 = vpop.f32.mrf.mxu0  ;;  %1012 = vmatmul.mubr.bf16.gmra.mxu1 %v462_v6 }
 0x10b   : > { %v416_v12 = vadd.f32 %v820_v42, %v415_v11  ;;  %v454_v13 = vmax.f32 %v424_v9, 0.0 }
 0x10c   : > { %v989_v14 = vpop.f32.mrf.mxu0 }
 0x10d   : > { %v452_v16 = vmax.f32 %v416_v12, 0.0  ;;  %v464_v20 = vpack.c.bf16 %v454_v13, %v453_v17  ;;  %v437_v24 = vadd.f32 %v989_v14, %v820_v42 }
 0x10e   : > { %v428_v18 = vpop.f32.mrf.mxu0 }
 0x10f   : > { %v463_v19 = vpack.c.bf16 %v452_v16, %v451_v15  ;;  %v429_v22 = vadd.f32 %v820_v42, %v428_v18  ;;  %v457_v30 = vmax.f32 %v437_v24, 0.0 }
 0x110   : > { %v990_v21 = vpop.f32.mrf.mxu0 }
 0x111   : > { %v440_v23 = vadd.f32 %v990_v21, %v820_v42  ;;  %1015 = vmatprep.mubr.bf16.mxu1 %v463_v19  ;;  %v455_v28 = vmax.f32 %v429_v22, 0.0 }
 0x112   : > { %v431_v25 = vpop.f32.mrf.mxu0  ;;  %1016 = vmatmul.mubr.bf16.gmra.mxu1 %v464_v20 }
 0x113   : > { %v432_v26 = vadd.f32 %v820_v42, %v431_v25  ;;  %v458_v27 = vmax.f32 %v440_v23, 0.0 }
 0x115   : > { %v456_v29 = vmax.f32 %v432_v26, 0.0  ;;  %v466_v32 = vpack.c.bf16 %v458_v27, %v457_v30 }
 0x117   : > { %v465_v31 = vpack.c.bf16 %v456_v29, %v455_v28 }
 0x119   : > { %1019 = vmatprep.mubr.bf16.mxu1 %v465_v31 }
 0x11a   : > { %1020 = vmatmul.mubr.bf16.gmra.mxu1 %v466_v32 }
 0x1c2   : > { %v1009_v33 = vpop.f32.mrf.mxu1 }
 0x1c3   : > { %v581_v36 = vadd.f32 %v1009_v33, %v829_v34 }
 0x1c4   : > { %v572_v35 = vpop.f32.mrf.mxu1 }
 0x1c5   : > { %v573_v38 = vadd.f32 %v829_v34, %v572_v35  ;;  %v637_v41 = vmax.f32 %v581_v36, 0.0 }
 0x1c6   : > { %v1010_v37 = vpop.f32.mrf.mxu1 }
 0x1c7   : > { %v584_v39 = vadd.f32 %v1010_v37, %v829_v34  ;;  %v635_v45 = vmax.f32 %v573_v38, 0.0 }
 0x1c8   : > { %v575_v40 = vpop.f32.mrf.mxu1 }
 0x1c9   : > { %v638_v42 = vmax.f32 %v584_v39, 0.0  ;;  %v576_v43 = vadd.f32 %v829_v34, %v575_v40 }
 0x1ca   : > { %v1013_v44 = vpop.f32.mrf.mxu1 }
 0x1cb   : > { %v888_v46 = vpack.c.bf16 %v638_v42, %v637_v41  ;;  %v636_v47 = vmax.f32 %v576_v43, 0.0  ;;  %v597_v50 = vadd.f32 %v1013_v44, %v829_v34 }
 0x1cc   : > { %v588_v48 = vpop.f32.mrf.mxu1 }
 0x1cd   : > { %920 = vst [vmem:[%s1305_s26 + $0x8] sm:$0xff] %v888_v46   ;;  %v883_v49 = vpack.c.bf16 %v636_v47, %v635_v45  ;;  %v589_v52 = vadd.f32 %v829_v34, %v588_v48  ;;  %v641_v55 = vmax.f32 %v597_v50, 0.0 }
 0x1ce   : > { %v1014_v51 = vpop.f32.mrf.mxu1 }
 0x1cf   : > { %884 = vst [vmem:[%s1305_s26] sm:$0xff] %v883_v49   ;;  %v600_v53 = vadd.f32 %v1014_v51, %v829_v34  ;;  %v639_v59 = vmax.f32 %v589_v52, 0.0 }
 0x1d0   : > { %v591_v54 = vpop.f32.mrf.mxu1 }
 0x1d1   : > { %v642_v56 = vmax.f32 %v600_v53, 0.0  ;;  %v592_v57 = vadd.f32 %v829_v34, %v591_v54 }
 0x1d2   : > { %v1017_v58 = vpop.f32.mrf.mxu1 }
 0x1d3   : > { %v898_v60 = vpack.c.bf16 %v642_v56, %v641_v55  ;;  %v640_v61 = vmax.f32 %v592_v57, 0.0  ;;  %v613_v0 = vadd.f32 %v1017_v58, %v829_v34 }
 0x1d4   : > { %v604_v62 = vpop.f32.mrf.mxu1 }
 0x1d5   : > { %922 = vst [vmem:[%s1305_s26 + $0x18] sm:$0xff] %v898_v60   ;;  %v893_v63 = vpack.c.bf16 %v640_v61, %v639_v59  ;;  %v605_v2 = vadd.f32 %v829_v34, %v604_v62  ;;  %v645_v5 = vmax.f32 %v613_v0, 0.0 }
 0x1d6   : > { %v1018_v1 = vpop.f32.mrf.mxu1 }
 0x1d7   : > { %921 = vst [vmem:[%s1305_s26 + $0x10] sm:$0xff] %v893_v63   ;;  %v616_v3 = vadd.f32 %v1018_v1, %v829_v34  ;;  %v643_v9 = vmax.f32 %v605_v2, 0.0 }
 0x1d8   : > { %v607_v4 = vpop.f32.mrf.mxu1 }
 0x1d9   : > { %v646_v6 = vmax.f32 %v616_v3, 0.0  ;;  %v608_v7 = vadd.f32 %v829_v34, %v607_v4 }
 0x1da   : > { %v1021_v8 = vpop.f32.mrf.mxu1 }
 0x1db   : > { %v908_v10 = vpack.c.bf16 %v646_v6, %v645_v5  ;;  %v644_v11 = vmax.f32 %v608_v7, 0.0  ;;  %v629_v14 = vadd.f32 %v1021_v8, %v829_v34 }
 0x1dc   : > { %v620_v12 = vpop.f32.mrf.mxu1 }
 0x1dd   : > { %924 = vst [vmem:[%s1305_s26 + $0x28] sm:$0xff] %v908_v10   ;;  %v903_v13 = vpack.c.bf16 %v644_v11, %v643_v9  ;;  %v621_v16 = vadd.f32 %v829_v34, %v620_v12  ;;  %v649_v19 = vmax.f32 %v629_v14, 0.0 }
 0x1de   : > { %v1022_v15 = vpop.f32.mrf.mxu1 }
 0x1df   : > { %923 = vst [vmem:[%s1305_s26 + $0x20] sm:$0xff] %v903_v13   ;;  %v632_v17 = vadd.f32 %v1022_v15, %v829_v34  ;;  %v647_v22 = vmax.f32 %v621_v16, 0.0 }
 0x1e0   : > { %v623_v18 = vpop.f32.mrf.mxu1 }
 0x1e1   : > { %v650_v20 = vmax.f32 %v632_v17, 0.0  ;;  %v624_v21 = vadd.f32 %v829_v34, %v623_v18 }
 0x1e3   : > { %v918_v23 = vpack.c.bf16 %v650_v20, %v649_v19  ;;  %v648_v24 = vmax.f32 %v624_v21, 0.0  ;;  %738 = sbr.rel (!%p1212_p5) target bundleno = 515 (0x203), region = 44 }
 0x1e5   : > { %926 = vst [vmem:[%s1305_s26 + $0x38] sm:$0xff] %v918_v23   ;;  %v913_v25 = vpack.c.bf16 %v648_v24, %v647_v22 }
 0x1e7   : > { %925 = vst [vmem:[%s1305_s26 + $0x30] sm:$0xff] %v913_v25  }
 0x1e8   : > { %s1390_s6 = smov (!%p741_p11, %s740_s6), 16 }
 0x1e9   : > { %s1322_s8 = sshll.u32 %s1390_s6, 6 }
 0x1ea   : > { %s745_s9 = ssub.s32 1024, %s1322_s8 }
 0x1eb   : > { %746 = vsyncadd %s1317_s30, %s745_s9  ;;  %p857_p12 = scmp.ne.s32.totalorder %s1322_s8, 0  ;;  %s879_s10 = sshll.u32 %s1195_s22, 10 }
 0x1ec   : > { %s1331_s12 = scalar_lea.hbm %s1382_s5, %s879_s10  ;;  %s751_s7 = sshll.u32 %s1305_s26, 4  ;;  %s1334_s7 = int_to_ptr.vmem [resolvable:$true] %s751_s7 }
 0x1ed   : > { %s1079_s13 = scalar_lea.vmem %s1334_s7, %s1322_s8  ;;  %s1141_s16 = smov [#allocation2]  }
 0x1ee   : > { %p1080_p13 = scmp.ne.s32.totalorder %s1334_s7, %s1079_s13  ;;  %s1083_s14 = sshll.u32 %s1141_s16, 4  ;;  %s1084_s14 = int_to_ptr.vmem [resolvable:$false] %s1083_s14 }
 0x1ef   : > { %s1085_s22 = scalar_lea.vmem %s1084_s14, 2048  ;;  %p1086_p2 = scmp.lt.s32.totalorder %s1334_s7, %s1084_s14 }
 0x1f0   : > { %p1081_p0 = pnand %p1080_p13, %p857_p12  ;;  %p1087_p3 = scmp.lt.s32.totalorder %s1085_s22, %s1079_s13 }
 0x1f2   : > { %p1082_p1 = pneg %p1081_p0  ;;  %p1088_p4 = por %p1087_p3, %p1086_p2 }
 0x1f4   : > { %p1089_p5 = pnand %p1088_p4, %p1082_p1 }
 0x1f6   : > { %1092 = shalt.err (!%p1089_p5)
}
 0x1f7   : > { %s1093_s15 = scalar_lea.hbm %s1331_s12, %s1322_s8  ;;  %s1097_s25 = scalar_lea.hbm %s1382_s5, 1600 }
 0x1f8   : > { %p1094_p7 = scmp.ne.s32.totalorder %s1331_s12, %s1093_s15  ;;  %p1098_p10 = scmp.lt.s32.totalorder %s1331_s12, %s1382_s5 }
 0x1f9   : > { %p1099_p11 = scmp.lt.s32.totalorder %s1097_s25, %s1093_s15 }
 0x1fa   : > { %p1095_p8 = pnand %p1094_p7, %p857_p12 }
 0x1fb   : > { %p1100_p13 = por %p1099_p11, %p1098_p10 }
 0x1fc   : > { %p1096_p9 = pneg %p1095_p8 }
 0x1fe   : > { %p1101_p0 = pnand %p1100_p13, %p1096_p9 }
 0x200   : > { %1104 = shalt.err (!%p1101_p0)
}
 0x201   : > { %s1142_s9 = smov 64   ;;  %s1143_s10 = smov 4  }
 0x202   : > { %757 = dma.vmem_to_hbm [thread:$0]  (%p857_p12), %s1334_s7, %s1322_s8, %s1331_s12, %s1317_s30, %s1142_s9, %s1142_s9, %s1143_s10  }
 0x203 PF: > { %p1028_p1 = scmp.ge.s32.totalorder %s1139_s21, 2  ;;  %s766_s11 = sand.u32 1, %s1127_s18  }
 0x204   : > { %s767_s28 = scalar_lea.sflag [#allocation3], %s766_s11 }
 0x205   : > { %p1025_p2 = pnand %p1028_p1, %p1216_p6 }
 0x207   : > { %p1026_p3 = pneg %p1025_p2 }
 0x209   : > { %1122 = dma.done.wait (%p1026_p3), %s767_s28, 1024  }
 0x20a   : > { %1124 = vsyncadd (%p1026_p3), %s767_s28, 4294966272  ;;  %p15_p4 = scmp.ge.s32.totalorder %s1199_s24, 4   ;;  %s1385_s18 = smov %s1131_s19 }
 0x20b   : > { %s1386_s19 = smov %s1135_s20  ;;  %s1387_s20 = smov %s1210_s27 }
 0x20c   : > { %s1388_s21 = smov %s1199_s24  ;;  %17 = sbr.rel (!%p15_p4) target bundleno = 3 (0x3), region = 75 }
 0x211   :  { %772 = vsyncpa [#allocation3], 1 }
 0x212   :  { %774 = vsyncpa [#allocation3 + $0x1], 1 }

</bundles_post_ra>
